<compile_context>
chip_gen: v7x
topology: tpu7x:2x2x1
jax: 0.10.0
libtpu: 0.0.40
codegen_flags: <defaults>
</compile_context>

<pallas_src>
import functools

import jax
import jax.numpy as jnp
from jax.experimental import pallas as pl
from jax.experimental.pallas import tpu as pltpu


def mlp_kernel(x_ref, w1_ref, b1_ref, w2_ref, b2_ref,
               w3_ref, b3_ref, w4_ref, b4_ref, o_ref, *, bf16_epilogue):
    # x_ref: (32, TB) bf16 (features padded 17->32 with zeros, batch on lanes).
    # Weights: (out, in) bf16.  Hidden biases: (out, 1) bf16 or f32 per variant.
    h = x_ref[...]

    if bf16_epilogue:
        # v6e / v7x: native bf16 VPU -> keep intermediates bf16 end to end.
        def layer(w_ref, b_ref, h):
            z = jnp.dot(w_ref[...], h, preferred_element_type=jnp.bfloat16) + b_ref[...]
            return jnp.maximum(z, 0.0)
    else:
        # v5e: no bf16 VALU -> bias + ReLU in f32, cast back to bf16 for the MXU.
        def layer(w_ref, b_ref, h):
            z = jnp.dot(w_ref[...], h, preferred_element_type=jnp.float32) + b_ref[...]
            return jnp.maximum(z, 0.0).astype(jnp.bfloat16)

    h = layer(w1_ref, b1_ref, h)        # (64, TB)
    h = layer(w2_ref, b2_ref, h)        # (32, TB)
    h = layer(w3_ref, b3_ref, h)        # (16, TB)
    # Final layer: f32 accumulation + f32 bias, lane-dense (1, TB) output row.
    o_ref[...] = (jnp.dot(w4_ref[...], h, preferred_element_type=jnp.float32)
                  + b4_ref[...])


def _tpu_generation():
    try:
        kind = jax.devices()[0].device_kind.lower()
    except Exception:
        return "unknown"
    if "v5 lite" in kind or "v5lite" in kind or "v5e" in kind:
        return "v5e"
    if "v6" in kind:
        return "v6e"
    if "v7" in kind or "7x" in kind:
        return "v7x"
    return "unknown"


# Per-generation tuning (tile cap, epilogue dtype, scoped-VMEM limit, megacore split).
_GEN_CONFIG = {
    "v5e":     dict(max_tile_b=8192,  bf16_epilogue=False, vmem_limit=64 << 20, split=False),
    "v6e":     dict(max_tile_b=16384, bf16_epilogue=True,  vmem_limit=64 << 20, split=False),
    "v7x":     dict(max_tile_b=16384, bf16_epilogue=True,  vmem_limit=48 << 20, split=True),
    "unknown": dict(max_tile_b=8192,  bf16_epilogue=False, vmem_limit=None,     split=False),
}

_LANE = 128
_F = 17
_F_PAD = 32   # feature dim padded so the bf16 x tile is sublane-aligned (16-packed)


def neural_network2_forward(x, params, *, max_tile_b=None, bf16_epilogue=None,
                            vmem_limit_bytes=None):
    """x: (B, 17) float32.  params: list of (W(out,in) f32, b(out,) f32).
    Returns (B,) float32, equivalent to the torch forward + x[:, 0]."""
    B, F = x.shape
    assert F == _F

    cfg = _GEN_CONFIG[_tpu_generation()]
    if max_tile_b is None:
        max_tile_b = cfg["max_tile_b"]
    if bf16_epilogue is None:
        bf16_epilogue = cfg["bf16_epilogue"]
    if vmem_limit_bytes is None:
        vmem_limit_bytes = cfg["vmem_limit"]

    # Batch tile: multiple of 128 (lane width), capped per generation.  On v7x,
    # split mid-size batches into >= 2 grid steps so both TensorCores get work.
    b_min = pl.cdiv(B, _LANE) * _LANE
    if cfg["split"] and b_min >= 2 * _LANE:
        half = pl.cdiv(pl.cdiv(b_min, 2), _LANE) * _LANE
        TB = min(max_tile_b, half)
    else:
        TB = min(max_tile_b, b_min)
    TB = max(TB, _LANE)
    num_tiles = pl.cdiv(B, TB)
    B_pad = num_tiles * TB

    # Single fused pass over x: cast to bf16 -> transpose to feature-major ->
    # zero-pad features 17->32 and batch to B_pad.  bf16 halves the dominant
    # HBM stream; padded columns are garbage-in/garbage-out and sliced off below.
    xt = jnp.pad(x.astype(jnp.bfloat16).T, ((0, _F_PAD - F), (0, B_pad - B)))

    hid_bias_dtype = jnp.bfloat16 if bf16_epilogue else jnp.float32
    (w1, b1), (w2, b2), (w3, b3), (w4, b4) = params
    w1 = jnp.pad(w1.astype(jnp.bfloat16), ((0, 0), (0, _F_PAD - F)))   # (64, 32)
    w2 = w2.astype(jnp.bfloat16)
    w3 = w3.astype(jnp.bfloat16)
    w4 = w4.astype(jnp.bfloat16)
    b1 = b1.reshape(-1, 1).astype(hid_bias_dtype)
    b2 = b2.reshape(-1, 1).astype(hid_bias_dtype)
    b3 = b3.reshape(-1, 1).astype(hid_bias_dtype)
    b4 = b4.reshape(-1, 1).astype(jnp.float32)

    def resident(a):
        # Full-array block, same block every grid step -> stays resident in VMEM.
        return pl.BlockSpec(a.shape, lambda i: (0, 0))

    kernel = functools.partial(mlp_kernel, bf16_epilogue=bf16_epilogue)

    out = pl.pallas_call(
        kernel,
        out_shape=jax.ShapeDtypeStruct((1, B_pad), jnp.float32),
        grid=(num_tiles,),
        in_specs=[
            pl.BlockSpec((_F_PAD, TB), lambda i: (0, i)),   # x tile (batch on lanes)
            resident(w1), resident(b1),
            resident(w2), resident(b2),
            resident(w3), resident(b3),
            resident(w4), resident(b4),
        ],
        out_specs=pl.BlockSpec((1, TB), lambda i: (0, i)),  # lane-dense output row
        compiler_params=pltpu.CompilerParams(
            dimension_semantics=("parallel",),
            vmem_limit_bytes=vmem_limit_bytes),
    )(xt, w1, b1, w2, b2, w3, b3, w4, b4)

    return out[0, :B]


def init_params(key):
    """Deterministic init mimicking nn.Linear's U(-1/sqrt(fan_in), 1/sqrt(fan_in)).
    Weights in PyTorch (out, in) orientation, biases as (out,)."""
    dims = [(17, 64), (64, 32), (32, 16), (16, 1)]
    params = []
    for (fan_in, fan_out) in dims:
        key, kw, kb = jax.random.split(key, 3)
        bound = 1.0 / jnp.sqrt(float(fan_in))
        w = jax.random.uniform(kw, (fan_out, fan_in), jnp.float32, -bound, bound)
        b = jax.random.uniform(kb, (fan_out,), jnp.float32, -bound, bound)
        params.append((w, b))
    return params


def reference_forward(x, params):
    h = x
    for i, (w, b) in enumerate(params):
        h = h @ w.T + b
        if i < len(params) - 1:
            h = jnp.maximum(h, 0.0)
    return h[:, 0]


if __name__ == "__main__":
    key = jax.random.PRNGKey(0)
    key, kx = jax.random.split(key)
    B = 8
    x = jax.random.normal(kx, (B, 17), dtype=jnp.float32)

    params = init_params(key)

    # jit so the wrapper's cast+transpose+pad fuses into one pass over x.
    fwd = jax.jit(neural_network2_forward)
    y = jax.block_until_ready(fwd(x, params))

    y_ref = reference_forward(x, params)
    assert y.shape == (B,)
    # bf16 matmul inputs (and bf16 epilogue on v6e/v7x) -> looser tolerance than f32.
    assert jnp.allclose(y, y_ref, atol=5e-2, rtol=5e-2), (y, y_ref)
    print("KERNEL_OK")
</pallas_src>

<mosaic_0001>
module attributes {stable_mosaic.version = 11 : i64} {
  func.func @mlp_kernel(%arg0: i32, %arg1: memref<32x128xbf16, #tpu.memory_space<vmem>>, %arg2: memref<64x32xbf16, #tpu.memory_space<vmem>>, %arg3: memref<64x1xf32, #tpu.memory_space<vmem>>, %arg4: memref<32x64xbf16, #tpu.memory_space<vmem>>, %arg5: memref<32x1xf32, #tpu.memory_space<vmem>>, %arg6: memref<16x32xbf16, #tpu.memory_space<vmem>>, %arg7: memref<16x1xf32, #tpu.memory_space<vmem>>, %arg8: memref<1x16xbf16, #tpu.memory_space<vmem>>, %arg9: memref<1x1xf32, #tpu.memory_space<vmem>>, %arg10: memref<1x128xf32, #tpu.memory_space<vmem>>) attributes {dimension_semantics = [#tpu.dimension_semantics<parallel>], iteration_bounds = array<i64: 1>, scalar_prefetch = 0 : i64, scratch_operands = 0 : i64, tpu.core_type = #tpu.core_type<tc>, window_params = [{transform_indices = @transform_0, window_bounds = array<i64: 32, 128>}, {pipeline_mode = #tpu.pipeline_mode<synchronous>, transform_indices = @transform_1, window_bounds = array<i64: 64, 32>}, {pipeline_mode = #tpu.pipeline_mode<synchronous>, transform_indices = @transform_2, window_bounds = array<i64: 64, 1>}, {pipeline_mode = #tpu.pipeline_mode<synchronous>, transform_indices = @transform_3, window_bounds = array<i64: 32, 64>}, {pipeline_mode = #tpu.pipeline_mode<synchronous>, transform_indices = @transform_4, window_bounds = array<i64: 32, 1>}, {pipeline_mode = #tpu.pipeline_mode<synchronous>, transform_indices = @transform_5, window_bounds = array<i64: 16, 32>}, {pipeline_mode = #tpu.pipeline_mode<synchronous>, transform_indices = @transform_6, window_bounds = array<i64: 16, 1>}, {pipeline_mode = #tpu.pipeline_mode<synchronous>, transform_indices = @transform_7, window_bounds = array<i64: 1, 16>}, {pipeline_mode = #tpu.pipeline_mode<synchronous>, transform_indices = @transform_8, window_bounds = array<i64: 1, 1>}, {transform_indices = @transform_9, window_bounds = array<i64: 1, 128>}]} {
    %c0 = arith.constant 0 : index
    %c0_0 = arith.constant 0 : index
    %0 = vector.load %arg1[%c0, %c0_0] : memref<32x128xbf16, #tpu.memory_space<vmem>>, vector<32x128xbf16>
    %c0_1 = arith.constant 0 : index
    %c0_2 = arith.constant 0 : index
    %1 = vector.load %arg2[%c0_1, %c0_2] : memref<64x32xbf16, #tpu.memory_space<vmem>>, vector<64x32xbf16>
    %cst = arith.constant dense<0.000000e+00> : vector<64x128xf32>
    %2 = tpu.matmul %1, %0, %cst {dimension_numbers = #tpu.dot_dimension_numbers<[1], [0], [0], [1], [0, 0, 1, 1], [], []>} : vector<64x32xbf16>, vector<32x128xbf16>, vector<64x128xf32> -> vector<64x128xf32>
    %c0_3 = arith.constant 0 : index
    %c0_4 = arith.constant 0 : index
    %3 = vector.load %arg3[%c0_3, %c0_4] : memref<64x1xf32, #tpu.memory_space<vmem>>, vector<64x1xf32>
    %4 = vector.broadcast %3 : vector<64x1xf32> to vector<64x128xf32>
    %5 = arith.addf %2, %4 : vector<64x128xf32>
    %cst_5 = arith.constant 0.000000e+00 : f32
    %6 = vector.broadcast %cst_5 : f32 to vector<64x128xf32>
    %7 = arith.maximumf %5, %6 : vector<64x128xf32>
    %8 = arith.truncf %7 : vector<64x128xf32> to vector<64x128xbf16>
    %c0_6 = arith.constant 0 : index
    %c0_7 = arith.constant 0 : index
    %9 = vector.load %arg4[%c0_6, %c0_7] : memref<32x64xbf16, #tpu.memory_space<vmem>>, vector<32x64xbf16>
    %cst_8 = arith.constant dense<0.000000e+00> : vector<32x128xf32>
    %10 = tpu.matmul %9, %8, %cst_8 {dimension_numbers = #tpu.dot_dimension_numbers<[1], [0], [0], [1], [0, 0, 1, 1], [], []>} : vector<32x64xbf16>, vector<64x128xbf16>, vector<32x128xf32> -> vector<32x128xf32>
    %c0_9 = arith.constant 0 : index
    %c0_10 = arith.constant 0 : index
    %11 = vector.load %arg5[%c0_9, %c0_10] : memref<32x1xf32, #tpu.memory_space<vmem>>, vector<32x1xf32>
    %12 = vector.broadcast %11 : vector<32x1xf32> to vector<32x128xf32>
    %13 = arith.addf %10, %12 : vector<32x128xf32>
    %cst_11 = arith.constant 0.000000e+00 : f32
    %14 = vector.broadcast %cst_11 : f32 to vector<32x128xf32>
    %15 = arith.maximumf %13, %14 : vector<32x128xf32>
    %16 = arith.truncf %15 : vector<32x128xf32> to vector<32x128xbf16>
    %c0_12 = arith.constant 0 : index
    %c0_13 = arith.constant 0 : index
    %17 = vector.load %arg6[%c0_12, %c0_13] : memref<16x32xbf16, #tpu.memory_space<vmem>>, vector<16x32xbf16>
    %cst_14 = arith.constant dense<0.000000e+00> : vector<16x128xf32>
    %18 = tpu.matmul %17, %16, %cst_14 {dimension_numbers = #tpu.dot_dimension_numbers<[1], [0], [0], [1], [0, 0, 1, 1], [], []>} : vector<16x32xbf16>, vector<32x128xbf16>, vector<16x128xf32> -> vector<16x128xf32>
    %c0_15 = arith.constant 0 : index
    %c0_16 = arith.constant 0 : index
    %19 = vector.load %arg7[%c0_15, %c0_16] : memref<16x1xf32, #tpu.memory_space<vmem>>, vector<16x1xf32>
    %20 = vector.broadcast %19 : vector<16x1xf32> to vector<16x128xf32>
    %21 = arith.addf %18, %20 : vector<16x128xf32>
    %cst_17 = arith.constant 0.000000e+00 : f32
    %22 = vector.broadcast %cst_17 : f32 to vector<16x128xf32>
    %23 = arith.maximumf %21, %22 : vector<16x128xf32>
    %24 = arith.truncf %23 : vector<16x128xf32> to vector<16x128xbf16>
    %c0_18 = arith.constant 0 : index
    %c0_19 = arith.constant 0 : index
    %25 = vector.load %arg8[%c0_18, %c0_19] : memref<1x16xbf16, #tpu.memory_space<vmem>>, vector<1x16xbf16>
    %cst_20 = arith.constant dense<0.000000e+00> : vector<1x128xf32>
    %26 = tpu.matmul %25, %24, %cst_20 {dimension_numbers = #tpu.dot_dimension_numbers<[1], [0], [0], [1], [0, 0, 1, 1], [], []>} : vector<1x16xbf16>, vector<16x128xbf16>, vector<1x128xf32> -> vector<1x128xf32>
    %c0_21 = arith.constant 0 : index
    %c0_22 = arith.constant 0 : index
    %27 = vector.load %arg9[%c0_21, %c0_22] : memref<1x1xf32, #tpu.memory_space<vmem>>, vector<1x1xf32>
    %28 = vector.broadcast %27 : vector<1x1xf32> to vector<1x128xf32>
    %29 = arith.addf %26, %28 : vector<1x128xf32>
    %c0_23 = arith.constant 0 : index
    %c0_24 = arith.constant 0 : index
    %30 = vector.load %arg10[%c0_23, %c0_24] : memref<1x128xf32, #tpu.memory_space<vmem>>, vector<1x128xf32>
    tpu.vector_store %arg10[%c0_23, %c0_24], %29 {strides = array<i32>} : memref<1x128xf32, #tpu.memory_space<vmem>>, vector<1x128xf32>,
    return
  }
  func.func @transform_0(%arg0: i32) -> (i32, i32) {
    %c0_i32 = arith.constant 0 : i32
    %c0_i32_0 = arith.constant 0 : i32
    return %c0_i32, %arg0 : i32, i32
  }
  func.func @transform_1(%arg0: i32) -> (i32, i32) {
    %c0_i32 = arith.constant 0 : i32
    %c0_i32_0 = arith.constant 0 : i32
    %c0_i32_1 = arith.constant 0 : i32
    return %c0_i32, %c0_i32_0 : i32, i32
  }
  func.func @transform_2(%arg0: i32) -> (i32, i32) {
    %c0_i32 = arith.constant 0 : i32
    %c0_i32_0 = arith.constant 0 : i32
    %c0_i32_1 = arith.constant 0 : i32
    return %c0_i32, %c0_i32_0 : i32, i32
  }
  func.func @transform_3(%arg0: i32) -> (i32, i32) {
    %c0_i32 = arith.constant 0 : i32
    %c0_i32_0 = arith.constant 0 : i32
    %c0_i32_1 = arith.constant 0 : i32
    return %c0_i32, %c0_i32_0 : i32, i32
  }
  func.func @transform_4(%arg0: i32) -> (i32, i32) {
    %c0_i32 = arith.constant 0 : i32
    %c0_i32_0 = arith.constant 0 : i32
    %c0_i32_1 = arith.constant 0 : i32
    return %c0_i32, %c0_i32_0 : i32, i32
  }
  func.func @transform_5(%arg0: i32) -> (i32, i32) {
    %c0_i32 = arith.constant 0 : i32
    %c0_i32_0 = arith.constant 0 : i32
    %c0_i32_1 = arith.constant 0 : i32
    return %c0_i32, %c0_i32_0 : i32, i32
  }
  func.func @transform_6(%arg0: i32) -> (i32, i32) {
    %c0_i32 = arith.constant 0 : i32
    %c0_i32_0 = arith.constant 0 : i32
    %c0_i32_1 = arith.constant 0 : i32
    return %c0_i32, %c0_i32_0 : i32, i32
  }
  func.func @transform_7(%arg0: i32) -> (i32, i32) {
    %c0_i32 = arith.constant 0 : i32
    %c0_i32_0 = arith.constant 0 : i32
    %c0_i32_1 = arith.constant 0 : i32
    return %c0_i32, %c0_i32_0 : i32, i32
  }
  func.func @transform_8(%arg0: i32) -> (i32, i32) {
    %c0_i32 = arith.constant 0 : i32
    %c0_i32_0 = arith.constant 0 : i32
    %c0_i32_1 = arith.constant 0 : i32
    return %c0_i32, %c0_i32_0 : i32, i32
  }
  func.func @transform_9(%arg0: i32) -> (i32, i32) {
    %c0_i32 = arith.constant 0 : i32
    %c0_i32_0 = arith.constant 0 : i32
    return %c0_i32, %arg0 : i32, i32
  }
}

</mosaic_0001>

<bundles_post_ra>
// kernel: neural_network2_forward.1
= control target key start
LH: loop header
LB: loop body
LE: loop exit
PB: predicated region body
PF: predicated region fallthrough
CT: control target
= control target key end

     0   :  { %v529_v1 = vmov 0   ;;  %vm127_vm0 = vcmask 261120   ;;  %vm255_vm1 = vcmask 523264   ;;  %v530_v61 = vmov 0.0   ;;  %s667_s0 = inlined_call_operand.vmem [shape: bf16[32,128], index: 0, kind: input, shape index: {}]   ;;  %s668_s1 = inlined_call_operand.vmem [shape: bf16[64,32], index: 1, kind: input, shape index: {}]   ;;  %s669_s8 = inlined_call_operand.<no memory space> [shape: f32[1,1], index: 8, kind: input, shape index: {}]   ;;  %s670_s2 = inlined_call_operand.vmem [shape: f32[64,1], index: 2, kind: input, shape index: {}]   ;;  %s671_s4 = inlined_call_operand.vmem [shape: f32[32,1], index: 4, kind: input, shape index: {}]   ;;  %s672_s6 = inlined_call_operand.vmem [shape: f32[16,1], index: 6, kind: input, shape index: {}]   ;;  %s673_s3 = inlined_call_operand.vmem [shape: bf16[32,64], index: 3, kind: input, shape index: {}]   ;;  %s674_s5 = inlined_call_operand.vmem [shape: bf16[16,32], index: 5, kind: input, shape index: {}]   ;;  %s675_s7 = inlined_call_operand.vmem [shape: bf16[1,16], index: 7, kind: input, shape index: {}]   ;;  %s676_s9 = inlined_call_operand.vmem [shape: f32[1,128], index: 9, kind: output, shape index: {}]  }
   0x1   :  { %v520_v0 = vld [vmem:[%s667_s0] sm:$0xff]   ;;  %518 = vset.pattern.permute.xlu0 %v529_v1  ;;  %519 = vset.pattern.permute.xlu1 %v529_v1  ;;  %v14_v2 = vstv %s669_s8  ;;  %v521_v3 = vld [vmem:[%s667_s0 + $0x8] sm:$0xff]   ;;  %v49_v7 = vld [vmem:[%s670_s2 + $0x10] sm:$0xff]  ;;  %vm531_vm2 = vmmov 0   ;;  %vm394_vm3 = vcmask 130048  }
   0x2   :  { %15 = vst [vmem:[#allocation2] sm:$0x1] %v14_v2  ;;  %477 = vmatprep.subr.bf16.mxu0 %v520_v0  ;;  %v522_v4 = vld [vmem:[%s668_s1] sm:$0xff]   ;;  %v523_v5 = vld [vmem:[%s668_s1 + $0x8] sm:$0xff]   ;;  %v524_v8 = vld [vmem:[%s668_s1 + $0x10] sm:$0xff]   ;;  %67 = vperm.xlu1 %519, %v49_v7  }
   0x3   :  { %478 = vmatpush3.bf16.msra.mxu0 %v520_v0  ;;  %481 = vmatprep.mubr.msk.bf16.mxu0 %vm127_vm0, %v522_v4  ;;  %v47_v6 = vld [vmem:[%s670_s2] sm:$0xff]  ;;  %v48_v9 = vld [vmem:[%s670_s2 + $0x8] sm:$0xff]  ;;  %v50_v10 = vld [vmem:[%s670_s2 + $0x18] sm:$0xff] }
   0x4   :  { %479 = vmatprep.subr.bf16.mxu0 %v521_v3  ;;  %57 = vperm.xlu0 %518, %v47_v6   ;;  %v51_v11 = vld [vmem:[%s670_s2 + $0x20] sm:$0xff]  ;;  %v52_v12 = vld [vmem:[%s670_s2 + $0x28] sm:$0xff]  ;;  %v525_v13 = vld [vmem:[%s668_s1 + $0x18] sm:$0xff]  }
   0x5   :  { %v53_v14 = vld [vmem:[%s670_s2 + $0x30] sm:$0xff]  ;;  %v54_v15 = vld [vmem:[%s670_s2 + $0x38] sm:$0xff]  ;;  %v221_v16 = vld [vmem:[%s671_s4] sm:$0xff] }
   0x6   :  { %72 = vperm.xlu1 %519, %v50_v10   ;;  %v222_v17 = vld [vmem:[%s671_s4 + $0x8] sm:$0xff]  ;;  %v223_v18 = vld [vmem:[%s671_s4 + $0x10] sm:$0xff]  ;;  %v224_v19 = vld [vmem:[%s671_s4 + $0x18] sm:$0xff] }
   0x7   :  { %480 = vmatpush3.bf16.msra.mxu0 %v521_v3  ;;  %v319_v20 = vld [vmem:[%s672_s6] sm:$0xff]  ;;  %v320_v21 = vld [vmem:[%s672_s6 + $0x8] sm:$0xff] }
   0x8   :  { %62 = vperm.xlu0 %518, %v48_v9   ;;  %v526_v23 = vld [vmem:[%s673_s3] sm:$0xff]   ;;  %v527_v60 = vld [vmem:[%s673_s3 + $0x8] sm:$0xff]   ;;  %501 = vmatprep.subr.bf16.mxu0 %v530_v61 }
   0x9   :  { %v384_v22 = vld [vmem:[#allocation2] sm:$0x1]  ;;  %497 = vmatprep.mubr.msk.bf16.mxu1 %vm255_vm1, %v526_v23 }
   0xa   :  { %482 = vmatmul.mubr.msk.bf16.vlgmr.msra.gmra.mrb[0].mxu0 %vm127_vm0, %v523_v5  ;;  %82 = vperm.xlu1 %519, %v52_v12  }
   0xb   :  { %485 = vmatprep.mubr.msk.bf16.mxu0 %vm127_vm0, %v524_v8 }
   0xc   :  { %77 = vperm.xlu0 %518, %v51_v11  }
   0xe   :  { %92 = vperm.xlu1 %519, %v54_v15  }
  0x10   :  { %87 = vperm.xlu0 %518, %v53_v14  }
  0x12   :  { %486 = vmatmul.mubr.msk.bf16.gmra.mrb[4].mxu0 %vm127_vm0, %v525_v13  ;;  %232 = vperm.xlu1 %519, %v222_v17  }
  0x13   :  { %505 = vmatprep.mubr.msk.bf16.mxu0 %vm531_vm2, %v530_v61 }
  0x14   :  { %227 = vperm.xlu0 %518, %v221_v16   ;;  %v528_v16 = vld [vmem:[%s674_s5] sm:$0xff]  }
  0x16   :  { %242 = vperm.xlu1 %519, %v224_v19  }
  0x18   :  { %237 = vperm.xlu0 %518, %v223_v18  }
  0x1a   :  { %328 = vperm.xlu1 %519, %v320_v21  }
  0x1c   :  { %323 = vperm.xlu0 %518, %v319_v20  }
  0x20   :  { %387 = vperm.xlu0 %518, %v384_v22  }
  0x81   :  { %v68_v25 = vpop.permute.xlu1 %67 }
  0x83   :  { %v58_v24 = vpop.permute.xlu0 %57 }
  0x85   :  { %v73_v27 = vpop.permute.xlu1 %72 }
  0x87   :  { %v63_v26 = vpop.permute.xlu0 %62 }
  0x89   :  { %v83_v36 = vpop.permute.xlu1 %82 }
  0x8b   :  { %v78_v31 = vpop.permute.xlu0 %77 }
  0x8d   :  { %v93_v48 = vpop.permute.xlu1 %92 }
  0x8f   :  { %v88_v43 = vpop.permute.xlu0 %87 }
  0x91   :  { %v233_v63 = vpop.permute.xlu1 %232 }
  0x93   :  { %v228_v62 = vpop.permute.xlu0 %227 }
  0x95   :  { %v243_v4 = vpop.permute.xlu1 %242 }
  0x97   :  { %v238_v0 = vpop.permute.xlu0 %237 }
  0x99   :  { %v329_v21 = vpop.permute.xlu1 %328 }
  0x9b   :  { %v324_v17 = vpop.permute.xlu0 %323 }
  0xdd   :  { %v483_v28 = vpop.f32.mrb[0].mxu0 }
  0xde   :  { %v183_v29 = vadd.f32 %v483_v28, %v68_v25  ;;  %v174_v30 = vpop.f32.mrb[1].mxu0  ;;  %v383_v28 = vld [vmem:[%s675_s7] sm:$0x1] }
  0xdf   :  { %v175_v32 = vadd.f32 %v174_v30, %v58_v24  ;;  %v484_v33 = vpop.f32.mrb[2].mxu0 }
  0xe0   :  { %v186_v34 = vadd.f32 %v484_v33, %v73_v27  ;;  %v177_v35 = vpop.f32.mrb[3].mxu0  ;;  %v207_v38 = vmax.f32 %v183_v29, 0.0  ;;  %v390_v29 = vlaneseq }
  0xe1   :  { %v178_v37 = vadd.f32 %v177_v35, %v63_v26  ;;  %v205_v40 = vmax.f32 %v175_v32, 0.0  ;;  %v388_v32 = vpop.permute.xlu0 %387 }
  0xe2   :  { %v208_v39 = vmax.f32 %v186_v34, 0.0  ;;  %v391_v30 = vshrl.u32 %v390_v29, 7 }
  0xe3   :  { %v206_v41 = vmax.f32 %v178_v37, 0.0 }
  0xe4   :  { %v214_v42 = vpack.c.bf16 %v208_v39, %v207_v38 }
  0xe5   :  { %v487_v44 = vpop.f32.mrb[4].mxu0  ;;  %v213_v45 = vpack.c.bf16 %v206_v41, %v205_v40 }
  0xe6   :  { %v199_v46 = vadd.f32 %v487_v44, %v88_v43  ;;  %v190_v47 = vpop.f32.mrb[5].mxu0 }
  0xe7   :  { %v191_v49 = vadd.f32 %v190_v47, %v78_v31  ;;  %v488_v50 = vpop.f32.mrb[6].mxu0  ;;  %489 = vmatprep.subr.bf16.mxu1 %v213_v45  ;;  %v392_v31 = vsub.s32 0, %v391_v30 }
  0xe8   :  { %v202_v51 = vadd.f32 %v488_v50, %v93_v48  ;;  %v193_v52 = vpop.f32.mrb[7].mxu0  ;;  %490 = vmatpush3.bf16.msra.mxu1 %v213_v45  ;;  %v211_v54 = vmax.f32 %v199_v46, 0.0 }
  0xe9   :  { %v194_v53 = vadd.f32 %v193_v52, %v83_v36  ;;  %491 = vmatprep.subr.bf16.mxu1 %v214_v42  ;;  %v209_v56 = vmax.f32 %v191_v49, 0.0  ;;  %v393_v33 = vrot.slane %v388_v32, %v392_v31 }
  0xea   :  { %v212_v55 = vmax.f32 %v202_v51, 0.0 }
  0xeb   :  { %v210_v57 = vmax.f32 %v194_v53, 0.0 }
  0xec   :  { %v216_v58 = vpack.c.bf16 %v212_v55, %v211_v54  ;;  %492 = vmatpush3.bf16.msra.mxu1 %v214_v42 }
  0xed   :  { %v215_v59 = vpack.c.bf16 %v210_v57, %v209_v56 }
  0xef   :  { %493 = vmatprep.subr.bf16.mxu1 %v215_v59 }
  0xf0   :  { %494 = vmatpush3.bf16.msra.mxu1 %v215_v59 }
  0xf1   :  { %495 = vmatprep.subr.bf16.mxu1 %v216_v58 }
  0xf4   :  { %496 = vmatpush3.bf16.msra.mxu1 %v216_v58 }
  0xf5   :  { %509 = vmatprep.subr.bf16.mxu1 %v530_v61 }
  0xf7   :  { %498 = vmatmul.mubr.msk.bf16.vlgmr.msra.gmra.mrb[0].mxu1 %vm255_vm1, %v527_v60 }
  0xf8   :  { %511 = vmatprep.mubr.msk.bf16.mxu1 %vm531_vm2, %v530_v61 }
 0x1ca   :  { %v499_v1 = vpop.f32.mrb[0].mxu1 }
 0x1cb   :  { %v305_v2 = vadd.f32 %v499_v1, %v238_v0  ;;  %v296_v3 = vpop.f32.mrb[1].mxu1 }
 0x1cc   :  { %v297_v5 = vadd.f32 %v296_v3, %v228_v62  ;;  %v500_v6 = vpop.f32.mrb[2].mxu1 }
 0x1cd   :  { %v308_v7 = vadd.f32 %v500_v6, %v243_v4  ;;  %v299_v8 = vpop.f32.mrb[3].mxu1  ;;  %v313_v10 = vmax.f32 %v305_v2, 0.0 }
 0x1ce   :  { %v300_v9 = vadd.f32 %v299_v8, %v233_v63  ;;  %v311_v12 = vmax.f32 %v297_v5, 0.0 }
 0x1cf   :  { %v314_v11 = vmax.f32 %v308_v7, 0.0 }
 0x1d0   :  { %v312_v13 = vmax.f32 %v300_v9, 0.0 }
 0x1d1   :  { %v316_v14 = vpack.c.bf16 %v314_v11, %v313_v10 }
 0x1d2   :  { %v315_v15 = vpack.c.bf16 %v312_v13, %v311_v12 }
 0x1d4   :  { %502 = vmatpush3.bf16.msra.mxu0 %v315_v15 }
 0x1d5   :  { %503 = vmatprep.subr.bf16.mxu0 %v530_v61 }
 0x1d8   :  { %504 = vmatpush3.bf16.msra.mxu0 %v316_v14 }
 0x1db   :  { %506 = vmatmul.mubr.msk.bf16.vlgmr.msra.gmra.mrb[8].mxu0 %vm127_vm0, %v528_v16 }
 0x2ae   :  { %v373_v18 = vpop.f32.mrb[8].mxu0 }
 0x2af   :  { %v374_v19 = vadd.f32 %v373_v18, %v324_v17  ;;  %v507_v20 = vpop.f32.mrb[9].mxu0 }
 0x2b0   :  { %v376_v22 = vpop.f32.mrb[10].mxu0 }
 0x2b1   :  { %v377_v23 = vadd.f32 %v376_v22, %v329_v21  ;;  %v508_v24 = vpop.f32.mrb[11].mxu0  ;;  %v380_v25 = vmax.f32 %v374_v19, 0.0 }
 0x2b3   :  { %v381_v26 = vmax.f32 %v377_v23, 0.0 }
 0x2b5   :  { %v382_v27 = vpack.c.bf16 %v381_v26, %v380_v25 }
 0x2b7   :  { %510 = vmatpush3.bf16.msra.mxu1 %v382_v27 }
 0x2ba   :  { %512 = vmatmul.mubr.msk.bf16.vlgmr.msra.gmra.mrb[4].mxu1 %vm394_vm3, %v383_v28 }
 0x38d   :  { %v432_v34 = vpop.f32.mrb[4].mxu1 }
 0x38e   :  { %v433_v35 = vadd.f32 %v432_v34, %v393_v33  ;;  %v513_v36 = vpop.f32.mrb[5].mxu1 }
 0x38f   :  { %v435_v37 = vpop.f32.mrb[6].mxu1 }
 0x390   :  { %438 = vst [vmem:[%s676_s9] sm:$0x1] %v433_v35  ;;  %v514_v38 = vpop.f32.mrb[7].mxu1 }

</bundles_post_ra>
